<compile_context>
chip_gen: v7x
topology: tpu7x:2x2x1
jax: 0.10.0
libtpu: 0.0.40
codegen_flags: <defaults>
</compile_context>

<pallas_src>
import jax
import jax.numpy as jnp
from jax.experimental import pallas as pl
from jax.experimental.pallas import tpu as pltpu


def _model_kernel(x1_ref, x2_ref, w_ref, b_ref, o_ref):
    """All refs live in SMEM (scalar path).

    x1_ref, x2_ref, w_ref: (2,) f32   b_ref: (1,) f32   o_ref: (2,) f32
    ~16 scalar ops on the 2-wide scalar ALU; the call is purely
    dispatch/DMA-latency bound, so no grid / VMEM / pipelining is used.
    """
    x1_0 = x1_ref[0]
    x1_1 = x1_ref[1]
    x2_0 = x2_ref[0]
    x2_1 = x2_ref[1]
    w_0 = w_ref[0]
    w_1 = w_ref[1]
    b = b_ref[0]

    # v4 @ x1.T : length-2 dot product as explicit scalar mul/adds
    s = x2_0 * x1_0 + x2_1 * x1_1

    # v6 = v5 + (v4 @ x1.T) + bias, with v5 = x1 * weight (bias broadcast over lanes)
    o_ref[0] = x1_0 * w_0 + s + b
    o_ref[1] = x1_1 * w_1 + s + b


def _model_forward(x1, x2, weight, bias):
    """x1, x2: (1, 2) f32; weight: (1, 2); bias: (1,). Returns (1, 1, 2)."""
    # Four separate tiny SMEM inputs — no concatenate, no extra HBM write/read.
    # The reshape(-1) calls are pure metadata (bitcast) under jit.
    out = pl.pallas_call(
        _model_kernel,
        out_shape=jax.ShapeDtypeStruct((2,), jnp.float32),
        in_specs=[
            pl.BlockSpec(memory_space=pltpu.MemorySpace.SMEM),  # x1 (2,)
            pl.BlockSpec(memory_space=pltpu.MemorySpace.SMEM),  # x2 (2,)
            pl.BlockSpec(memory_space=pltpu.MemorySpace.SMEM),  # weight (2,)
            pl.BlockSpec(memory_space=pltpu.MemorySpace.SMEM),  # bias (1,)
        ],
        out_specs=pl.BlockSpec(memory_space=pltpu.MemorySpace.SMEM),
    )(
        x1.reshape(-1),
        x2.reshape(-1),
        weight.reshape(-1),
        bias.reshape(-1),
    )

    # v6.reshape((1,) + x1.size()) -> (1, 1, 2); metadata-only reshape.
    return out.reshape((1,) + x1.shape)


# jit the wrapper so the (metadata-only) reshapes fuse around the single dispatch.
model_forward = jax.jit(_model_forward)


if __name__ == "__main__":
    key = jax.random.PRNGKey(0)
    k1, k2, kw, kb = jax.random.split(key, 4)

    # Inputs (match the module: x1, x2 of shape (1, 2))
    x1 = jax.random.normal(k1, (1, 2), dtype=jnp.float32)
    x2 = jax.random.normal(k2, (1, 2), dtype=jnp.float32)

    # Deterministic Linear(2, 1) parameters
    weight = jax.random.normal(kw, (1, 2), dtype=jnp.float32) * 0.5
    bias = jax.random.normal(kb, (1,), dtype=jnp.float32) * 0.5

    out = model_forward(x1, x2, weight, bias)
    jax.block_until_ready(out)

    # Pure-JAX reference check of the same semantics
    v5 = x1 * weight
    ref = (v5 + x2 @ x1.T + bias).reshape((1,) + x1.shape)
    assert out.shape == (1, 1, 2), out.shape
    assert jnp.allclose(out, ref, atol=1e-5), (out, ref)

    print("KERNEL_OK")
</pallas_src>

<mosaic_0001>
module attributes {stable_mosaic.version = 11 : i64} {
  func.func @_model_kernel(%arg0: memref<2xf32, #tpu.memory_space<smem>>, %arg1: memref<2xf32, #tpu.memory_space<smem>>, %arg2: memref<2xf32, #tpu.memory_space<smem>>, %arg3: memref<1xf32, #tpu.memory_space<smem>>, %arg4: memref<2xf32, #tpu.memory_space<smem>>) attributes {dimension_semantics = [], scalar_prefetch = 0 : i64, scratch_operands = 0 : i64, tpu.core_type = #tpu.core_type<tc>} {
    %c0 = arith.constant 0 : index
    %0 = memref.load %arg0[%c0] : memref<2xf32, #tpu.memory_space<smem>>
    %c1 = arith.constant 1 : index
    %1 = memref.load %arg0[%c1] : memref<2xf32, #tpu.memory_space<smem>>
    %c0_0 = arith.constant 0 : index
    %2 = memref.load %arg1[%c0_0] : memref<2xf32, #tpu.memory_space<smem>>
    %c1_1 = arith.constant 1 : index
    %3 = memref.load %arg1[%c1_1] : memref<2xf32, #tpu.memory_space<smem>>
    %c0_2 = arith.constant 0 : index
    %4 = memref.load %arg2[%c0_2] : memref<2xf32, #tpu.memory_space<smem>>
    %c1_3 = arith.constant 1 : index
    %5 = memref.load %arg2[%c1_3] : memref<2xf32, #tpu.memory_space<smem>>
    %c0_4 = arith.constant 0 : index
    %6 = memref.load %arg3[%c0_4] : memref<1xf32, #tpu.memory_space<smem>>
    %7 = arith.mulf %2, %0 : f32
    %8 = arith.mulf %3, %1 : f32
    %9 = arith.addf %7, %8 : f32
    %10 = arith.mulf %0, %4 : f32
    %11 = arith.addf %10, %9 : f32
    %12 = arith.addf %11, %6 : f32
    %c0_5 = arith.constant 0 : index
    %13 = memref.load %arg4[%c0_5] : memref<2xf32, #tpu.memory_space<smem>>
    memref.store %12, %arg4[%c0_5] : memref<2xf32, #tpu.memory_space<smem>>
    %14 = arith.mulf %1, %5 : f32
    %15 = arith.addf %14, %9 : f32
    %16 = arith.addf %15, %6 : f32
    %c1_6 = arith.constant 1 : index
    %17 = memref.load %arg4[%c1_6] : memref<2xf32, #tpu.memory_space<smem>>
    memref.store %16, %arg4[%c1_6] : memref<2xf32, #tpu.memory_space<smem>>
    return
  }
}

</mosaic_0001>

<bundles_post_ra>
// kernel: _model_forward.1
= control target key start
LH: loop header
LB: loop body
LE: loop exit
PB: predicated region body
PF: predicated region fallthrough
CT: control target
= control target key end

     0   :  { %10 = vsyncpa [#allocation5], 0  ;;  %s205_s0 = inlined_call_operand.vmem [shape: f32[2], index: 0, kind: input, shape index: {}]   ;;  %s206_s1 = inlined_call_operand.vmem [shape: f32[2], index: 1, kind: input, shape index: {}]   ;;  %s207_s2 = inlined_call_operand.vmem [shape: f32[2], index: 2, kind: input, shape index: {}]   ;;  %s208_s3 = inlined_call_operand.<no memory space> [shape: f32[1], index: 3, kind: input, shape index: {}]   ;;  %s209_s4 = inlined_call_operand.hbm [shape: f32[2], index: 4, kind: output, shape index: {}]  }
   0x1   :  { %11 = vsyncpa [#allocation7], 0  ;;  %s29_s17 = sshll.u32 %s206_s1, 4  ;;  %s30_s17 = int_to_ptr.vmem [resolvable:$true] %s29_s17 }
   0x2   :  { %12 = vsyncpa [#allocation4], 0  ;;  %s19_s20 = sshll.u32 %s205_s0, 4  ;;  %s97_s21 = scalar_lea.vmem %s30_s17, 16  ;;  %s20_s20 = int_to_ptr.vmem [resolvable:$true] %s19_s20 }
   0x3   :  { %p98_p0 = scmp.ne.s32.totalorder %s30_s17, %s97_s21  ;;  %p102_p1 = scmp.lt.s32.totalorder %s30_s17, %s30_s17 }
   0x4   :  { %p103_p2 = scmp.lt.s32.totalorder %s97_s21, %s97_s21 }
   0x6   :  { %p104_p3 = por %p103_p2, %p102_p1 }
   0x8   :  { %p105_p4 = pnand %p104_p3, %p98_p0 }
   0xa   :  { %108 = shalt.err (!%p105_p4)
}
   0xb   :  { %s149_s22 = smov [#allocation6]   ;;  %s109_s23 = scalar_lea.vmem %s20_s20, 16 }
   0xc   :  { %32 = dma.vmem_to_smem %s30_s17, 16, %s149_s22, [#allocation7]  }
   0xd   :  { %p110_p5 = scmp.ne.s32.totalorder %s20_s20, %s109_s23  ;;  %p114_p6 = scmp.lt.s32.totalorder %s20_s20, %s20_s20 }
   0xe   :  { %p115_p7 = scmp.lt.s32.totalorder %s109_s23, %s109_s23 }
  0x10   :  { %p116_p8 = por %p115_p7, %p114_p6 }
  0x12   :  { %p117_p9 = pnand %p116_p8, %p110_p5 }
  0x14   :  { %120 = shalt.err (!%p117_p9)
}
  0x15   :  { %s150_s1 = smov [#allocation3]   ;;  %s39_s25 = sshll.u32 %s207_s2, 4  ;;  %s40_s25 = int_to_ptr.vmem [resolvable:$true] %s39_s25 }
  0x16   :  { %22 = dma.vmem_to_smem %s20_s20, 16, %s150_s1, [#allocation5]  }
  0x17   :  { %s121_s26 = scalar_lea.vmem %s40_s25, 16  ;;  %p126_p11 = scmp.lt.s32.totalorder %s40_s25, %s40_s25 }
  0x18   :  { %p122_p10 = scmp.ne.s32.totalorder %s40_s25, %s121_s26  ;;  %p127_p12 = scmp.lt.s32.totalorder %s121_s26, %s121_s26 }
  0x1a   :  { %p128_p13 = por %p127_p12, %p126_p11 }
  0x1c   :  { %p129_p0 = pnand %p128_p13, %p122_p10 }
  0x1e   :  { %132 = shalt.err (!%p129_p0)
}
  0x1f   :  { %s151_s27 = smov [#allocation8]  }
  0x20   :  { %42 = dma.vmem_to_smem %s40_s25, 16, %s151_s27, [#allocation7]  }
  0x21   :  { %143 = dma.done.wait [#allocation5], 16  }
  0x22   :  { %144 = vsyncadd [#allocation5], 4294967280 }
  0x23   :  { %145 = dma.done.wait [#allocation7], 32  }
  0x24   :  { %146 = vsyncadd [#allocation7], 4294967264 }
  0x25   :  { %54 = sfence }
  0x26   :  { %s55_s28 = sld [smem:[#allocation3]]  ;;  %s90_s29 = sld [smem:[#allocation3 + $0x1]] }
  0x27   :  { %s57_s30 = sld [smem:[#allocation6]]  ;;  %s91_s5 = sld [smem:[#allocation6 + $0x1]] }
  0x28   :  { %s59_s2 = sld [smem:[#allocation8]]  ;;  %s92_s6 = sld [smem:[#allocation8 + $0x1]] }
  0x29   :  { %s133_s22 = scalar_lea.hbm %s209_s4, 16 }
  0x2a   :  { %p134_p1 = scmp.ne.s32.totalorder %s209_s4, %s133_s22  ;;  %p137_p2 = scmp.lt.u32.totalorder %s133_s22, %s209_s4 }
  0x2c   :  { %p139_p3 = pnand %p137_p2, %p134_p1 }
  0x2d   :  { %s62_s7 = smul.f32 %s57_s30, %s55_s28 }
  0x2e   :  { %s63_s8 = smul.f32 %s91_s5, %s90_s29 }
  0x2f   :  { %s65_s9 = smul.f32 %s59_s2, %s55_s28 }
  0x30   :  { %s64_s10 = sadd.f32 %s63_s8, %s62_s7  ;;  %s70_s11 = smul.f32 %s92_s6, %s90_s29 }
  0x32   :  { %s66_s12 = sadd.f32 %s65_s9, %s64_s10 }
  0x33   :  { %s71_s13 = sadd.f32 %s70_s11, %s64_s10 }
  0x34   :  { %s67_s16 = sadd.f32 %s66_s12, %s208_s3 }
  0x35   :  { %s72_s19 = sadd.f32 %s71_s13, %s208_s3 }
  0x36   :  { %69 = sst [smem:[#allocation9]] %s67_s16 }
  0x37   :  { %74 = sst [smem:[#allocation9 + $0x1]] %s72_s19 }
  0x38   :  { %142 = shalt.err (!%p139_p3)
}
  0x39   :  { %s152_s25 = smov [#allocation9]  }
  0x3a   :  { %82 = dma.smem_to_hbm %s152_s25, 16, %s209_s4, [#allocation4]  }
  0x3b   :  { %147 = dma.done.wait [#allocation4], 16  }
  0x3c   :  { %148 = vsyncadd [#allocation4], 4294967280 }
  0x3d   :  { %86 = sfence }
  0x3e   :  { %87 = vsyncpa [#allocation4], 1 }
  0x3f   :  { %88 = vsyncpa [#allocation5], 1 }
  0x40   :  { %89 = vsyncpa [#allocation7], 1 }

</bundles_post_ra>
